<compile_context>
chip_gen: v5e
topology: v5e:2x2
jax: 0.10.0
libtpu: 0.0.40
codegen_flags: <defaults>
</compile_context>

<pallas_src>
import jax
import jax.numpy as jnp
from jax.experimental import pallas as pl
from jax.experimental.pallas import tpu as pltpu

B, S, D = 2, 8, 128   # batch, max_seq_len, d_model (D multiple of 128 -> lane-dense)
EPS = 1e-8


def retrieval_head_kernel(vis_pos_ref, vis_neg_ref, text_ref,
                          w_pool_ref, b_pool_ref, w_proj_t_ref, b_proj_ref,
                          loss_ref):
    nb = text_ref.shape[0]            # B
    d = text_ref.shape[2]             # D

    w_pool = w_pool_ref[...].reshape(1, 1, d)   # (1,1,D)  pooling_linear.weight
    b_pool = b_pool_ref[0]                      # scalar   pooling_linear.bias (SMEM)
    w_proj_t = w_proj_t_ref[...]                # (D,D)    common_projection.weight^T, bf16
    b_proj = b_proj_ref[...]                    # (1,D)    common_projection.bias, f32

    def vis_pool(v):
        # pooling_linear(v) -> (B,S,1); softmax over seq; weighted sum (== bmm).
        agg = jnp.sum(v * w_pool, axis=-1, keepdims=True) + b_pool       # (B,S,1)
        m = jnp.max(agg, axis=1, keepdims=True)
        e = jnp.exp(agg - m)
        p = e / jnp.sum(e, axis=1, keepdims=True)                        # exact div
        return jnp.sum(v * p, axis=1)                                    # (B,D)

    h_pos_raw = vis_pool(vis_pos_ref[...])
    h_neg_raw = vis_pool(vis_neg_ref[...])
    h_txt_raw = jnp.mean(text_ref[...], axis=1)      # adaptive_avg_pool1d -> mean

    # Stack only the pooled vectors -> one projection matmul on the MXU.
    h_raw = jnp.concatenate([h_txt_raw, h_pos_raw, h_neg_raw], axis=0)   # (3B,D)

    # nn.Linear: y = x @ W^T + b  (bf16 operands, f32 accumulation).
    h = jnp.dot(h_raw.astype(jnp.bfloat16), w_proj_t,
                preferred_element_type=jnp.float32) + b_proj             # (3B,D) f32

    t = h[:nb]
    p = h[nb:2 * nb]
    n = h[2 * nb:]

    # All cosine terms from one stacked lane reduction (no Gram matrix).
    prods = jnp.concatenate([t * t, p * p, n * n, t * p, t * n], axis=0)  # (5B,D)
    sums = jnp.sum(prods, axis=-1, keepdims=True)                         # (5B,1)

    n_t = sums[:nb]
    n_p = sums[nb:2 * nb]
    n_n = sums[2 * nb:3 * nb]
    d_tp = sums[3 * nb:4 * nb]
    d_tn = sums[4 * nb:]

    # torch.nn.functional.cosine_similarity: clamp each norm by eps.
    r_t = jnp.maximum(jnp.sqrt(n_t), EPS)
    r_p = jnp.maximum(jnp.sqrt(n_p), EPS)
    r_n = jnp.maximum(jnp.sqrt(n_n), EPS)
    sims_pos = d_tp / (r_t * r_p)                                         # (B,1)
    sims_neg = d_tn / (r_t * r_n)                                         # (B,1)

    # hinge loss: mean(max(1 - sims_pos + sims_neg, 0))
    loss = jnp.maximum(1.0 - sims_pos + sims_neg, 0.0)                    # (B,1)
    loss_ref[...] = jnp.sum(loss, axis=0, keepdims=True) * jnp.float32(1.0 / nb)


def retrieval_net_loss(vis_pos_emb, vis_neg_emb, text_emb,
                       w_pool, b_pool, w_proj, b_proj):
    """RetrievalNet margin loss (vis_pooling == 'linear')."""
    _, _, d = text_emb.shape
    # Trace-time parameter plumbing (free): pre-transpose + pre-cast the
    # projection weight (halves its DMA), shape biases for SMEM / lane use.
    w_proj_t = jnp.transpose(w_proj).astype(jnp.bfloat16)   # (D, D) bf16
    w_pool_row = w_pool.reshape(1, d)                        # (1, D)
    b_pool_1d = b_pool.reshape(-1)                           # (1,)  -> SMEM scalar
    b_proj_row = b_proj.reshape(1, d)                        # (1, D)

    vmem = pl.BlockSpec(memory_space=pltpu.MemorySpace.VMEM)
    smem = pl.BlockSpec(memory_space=pltpu.MemorySpace.SMEM)

    out = pl.pallas_call(
        retrieval_head_kernel,
        out_shape=jax.ShapeDtypeStruct((1, 1), jnp.float32),
        in_specs=[vmem, vmem, vmem, vmem, smem, vmem, vmem],
        out_specs=vmem,
    )(vis_pos_emb, vis_neg_emb, text_emb,
      w_pool_row, b_pool_1d, w_proj_t, b_proj_row)
    return out[0, 0]


if __name__ == "__main__":
    key = jax.random.PRNGKey(0)
    k1, k2, k3, k4, k5, k6, k7 = jax.random.split(key, 7)

    # Encoder outputs (stand-ins for ASTEncoder / NLEncoder outputs).
    vis_pos_emb = jax.random.normal(k1, (B, S, D), dtype=jnp.float32)
    vis_neg_emb = jax.random.normal(k2, (B, S, D), dtype=jnp.float32)
    text_emb = jax.random.normal(k3, (B, S, D), dtype=jnp.float32)

    # Parameter shapes as in the module's __init__:
    #   pooling_linear    = nn.Linear(d_model, 1)        -> W (1, D), b (1,)
    #   common_projection = nn.Linear(d_model, d_model)  -> W (D, D), b (D,)
    w_pool = 0.1 * jax.random.normal(k4, (1, D), dtype=jnp.float32)
    b_pool = 0.1 * jax.random.normal(k5, (1,), dtype=jnp.float32)
    w_proj = 0.1 * jax.random.normal(k6, (D, D), dtype=jnp.float32)
    b_proj = 0.1 * jax.random.normal(k7, (D,), dtype=jnp.float32)

    loss = retrieval_net_loss(vis_pos_emb, vis_neg_emb, text_emb,
                              w_pool, b_pool, w_proj, b_proj)
    jax.block_until_ready(loss)

    # Pure-JAX references of the same forward math.
    def reference_loss(project_in_bf16):
        wt = w_proj.T

        def project(h):
            if project_in_bf16:   # matches the kernel's MXU dtype exactly
                return jnp.dot(h.astype(jnp.bfloat16), wt.astype(jnp.bfloat16),
                               preferred_element_type=jnp.float32) + b_proj
            return h @ wt + b_proj

        def vis_hidden(v):
            agg = jnp.einsum("bsd,kd->bsk", v, w_pool) + b_pool[0]
            p = jax.nn.softmax(agg, axis=1)
            return project(jnp.sum(v * p, axis=1))

        h_pos = vis_hidden(vis_pos_emb)
        h_neg = vis_hidden(vis_neg_emb)
        t_h = project(jnp.mean(text_emb, axis=1))

        def cosine(a, b):   # per-norm eps clamp (current torch semantics)
            num = jnp.sum(a * b, axis=-1)
            ra = jnp.maximum(jnp.sqrt(jnp.sum(a * a, axis=-1)), EPS)
            rb = jnp.maximum(jnp.sqrt(jnp.sum(b * b, axis=-1)), EPS)
            return num / (ra * rb)

        l = 1.0 - cosine(t_h, h_pos) + cosine(t_h, h_neg)
        return jnp.mean(jnp.maximum(l, 0.0))

    ref_kernel_math = reference_loss(project_in_bf16=True)    # same math as kernel
    ref_module_f32 = reference_loss(project_in_bf16=False)    # module (f32) math

    # Tight check vs the bf16-projection reference (kernel math is otherwise exact).
    assert jnp.allclose(loss, ref_kernel_math, atol=1e-3, rtol=1e-3), (loss, ref_kernel_math)
    # Looser check vs the pure-f32 module math (accounts for bf16 MXU operands).
    assert jnp.allclose(loss, ref_module_f32, atol=2e-2, rtol=2e-2), (loss, ref_module_f32)
    print("KERNEL_OK")
</pallas_src>

<mosaic_0001>
module attributes {stable_mosaic.version = 11 : i64} {
  func.func @retrieval_head_kernel(%arg0: memref<2x8x128xf32, #tpu.memory_space<vmem>>, %arg1: memref<2x8x128xf32, #tpu.memory_space<vmem>>, %arg2: memref<2x8x128xf32, #tpu.memory_space<vmem>>, %arg3: memref<1x128xf32, #tpu.memory_space<vmem>>, %arg4: memref<1xf32, #tpu.memory_space<smem>>, %arg5: memref<128x128xbf16, #tpu.memory_space<vmem>>, %arg6: memref<1x128xf32, #tpu.memory_space<vmem>>, %arg7: memref<1x1xf32, #tpu.memory_space<vmem>>) attributes {dimension_semantics = [], scalar_prefetch = 0 : i64, scratch_operands = 0 : i64, tpu.core_type = #tpu.core_type<tc>} {
    %c0 = arith.constant 0 : index
    %c0_0 = arith.constant 0 : index
    %0 = vector.load %arg3[%c0, %c0_0] : memref<1x128xf32, #tpu.memory_space<vmem>>, vector<1x128xf32>
    %1 = vector.shape_cast %0 : vector<1x128xf32> to vector<1x1x128xf32>
    %c0_1 = arith.constant 0 : index
    %2 = memref.load %arg4[%c0_1] : memref<1xf32, #tpu.memory_space<smem>>
    %c0_2 = arith.constant 0 : index
    %c0_3 = arith.constant 0 : index
    %3 = vector.load %arg5[%c0_2, %c0_3] : memref<128x128xbf16, #tpu.memory_space<vmem>>, vector<128x128xbf16>
    %c0_4 = arith.constant 0 : index
    %c0_5 = arith.constant 0 : index
    %4 = vector.load %arg6[%c0_4, %c0_5] : memref<1x128xf32, #tpu.memory_space<vmem>>, vector<1x128xf32>
    %c0_6 = arith.constant 0 : index
    %c0_7 = arith.constant 0 : index
    %c0_8 = arith.constant 0 : index
    %5 = vector.load %arg0[%c0_6, %c0_7, %c0_8] : memref<2x8x128xf32, #tpu.memory_space<vmem>>, vector<2x8x128xf32>
    %6 = vector.broadcast %1 : vector<1x1x128xf32> to vector<2x8x128xf32>
    %7 = arith.mulf %5, %6 : vector<2x8x128xf32>
    %cst = arith.constant dense<0.000000e+00> : vector<2x8xf32>
    %8 = vector.multi_reduction <add>, %7, %cst [2] : vector<2x8x128xf32> to vector<2x8xf32>
    %9 = vector.shape_cast %8 : vector<2x8xf32> to vector<2x8x1xf32>
    %10 = vector.broadcast %2 : f32 to vector<2x8x1xf32>
    %11 = arith.addf %9, %10 : vector<2x8x1xf32>
    %cst_9 = arith.constant dense<0xFF800000> : vector<2x1xf32>
    %12 = vector.multi_reduction <maximumf>, %11, %cst_9 [1] : vector<2x8x1xf32> to vector<2x1xf32>
    %13 = vector.shape_cast %12 : vector<2x1xf32> to vector<2x1x1xf32>
    %14 = vector.broadcast %13 : vector<2x1x1xf32> to vector<2x8x1xf32>
    %15 = arith.subf %11, %14 : vector<2x8x1xf32>
    %16 = math.exp %15 : vector<2x8x1xf32>
    %cst_10 = arith.constant dense<0.000000e+00> : vector<2x1xf32>
    %17 = vector.multi_reduction <add>, %16, %cst_10 [1] : vector<2x8x1xf32> to vector<2x1xf32>
    %18 = vector.shape_cast %17 : vector<2x1xf32> to vector<2x1x1xf32>
    %19 = vector.broadcast %18 : vector<2x1x1xf32> to vector<2x8x1xf32>
    %20 = arith.divf %16, %19 : vector<2x8x1xf32>
    %21 = vector.broadcast %20 : vector<2x8x1xf32> to vector<2x8x128xf32>
    %22 = arith.mulf %5, %21 : vector<2x8x128xf32>
    %cst_11 = arith.constant dense<0.000000e+00> : vector<2x128xf32>
    %23 = vector.multi_reduction <add>, %22, %cst_11 [1] : vector<2x8x128xf32> to vector<2x128xf32>
    %c0_12 = arith.constant 0 : index
    %c0_13 = arith.constant 0 : index
    %c0_14 = arith.constant 0 : index
    %24 = vector.load %arg1[%c0_12, %c0_13, %c0_14] : memref<2x8x128xf32, #tpu.memory_space<vmem>>, vector<2x8x128xf32>
    %25 = vector.broadcast %1 : vector<1x1x128xf32> to vector<2x8x128xf32>
    %26 = arith.mulf %24, %25 : vector<2x8x128xf32>
    %cst_15 = arith.constant dense<0.000000e+00> : vector<2x8xf32>
    %27 = vector.multi_reduction <add>, %26, %cst_15 [2] : vector<2x8x128xf32> to vector<2x8xf32>
    %28 = vector.shape_cast %27 : vector<2x8xf32> to vector<2x8x1xf32>
    %29 = vector.broadcast %2 : f32 to vector<2x8x1xf32>
    %30 = arith.addf %28, %29 : vector<2x8x1xf32>
    %cst_16 = arith.constant dense<0xFF800000> : vector<2x1xf32>
    %31 = vector.multi_reduction <maximumf>, %30, %cst_16 [1] : vector<2x8x1xf32> to vector<2x1xf32>
    %32 = vector.shape_cast %31 : vector<2x1xf32> to vector<2x1x1xf32>
    %33 = vector.broadcast %32 : vector<2x1x1xf32> to vector<2x8x1xf32>
    %34 = arith.subf %30, %33 : vector<2x8x1xf32>
    %35 = math.exp %34 : vector<2x8x1xf32>
    %cst_17 = arith.constant dense<0.000000e+00> : vector<2x1xf32>
    %36 = vector.multi_reduction <add>, %35, %cst_17 [1] : vector<2x8x1xf32> to vector<2x1xf32>
    %37 = vector.shape_cast %36 : vector<2x1xf32> to vector<2x1x1xf32>
    %38 = vector.broadcast %37 : vector<2x1x1xf32> to vector<2x8x1xf32>
    %39 = arith.divf %35, %38 : vector<2x8x1xf32>
    %40 = vector.broadcast %39 : vector<2x8x1xf32> to vector<2x8x128xf32>
    %41 = arith.mulf %24, %40 : vector<2x8x128xf32>
    %cst_18 = arith.constant dense<0.000000e+00> : vector<2x128xf32>
    %42 = vector.multi_reduction <add>, %41, %cst_18 [1] : vector<2x8x128xf32> to vector<2x128xf32>
    %c0_19 = arith.constant 0 : index
    %c0_20 = arith.constant 0 : index
    %c0_21 = arith.constant 0 : index
    %43 = vector.load %arg2[%c0_19, %c0_20, %c0_21] : memref<2x8x128xf32, #tpu.memory_space<vmem>>, vector<2x8x128xf32>
    %cst_22 = arith.constant dense<0.000000e+00> : vector<2x128xf32>
    %44 = vector.multi_reduction <add>, %43, %cst_22 [1] : vector<2x8x128xf32> to vector<2x128xf32>
    %cst_23 = arith.constant 8.000000e+00 : f32
    %45 = vector.broadcast %cst_23 : f32 to vector<2x128xf32>
    %46 = arith.divf %44, %45 : vector<2x128xf32>
    %47 = tpu.concatenate %46, %23, %42 in 0 : vector<2x128xf32>, vector<2x128xf32>, vector<2x128xf32> -> vector<6x128xf32>
    %48 = arith.truncf %47 : vector<6x128xf32> to vector<6x128xbf16>
    %cst_24 = arith.constant dense<0.000000e+00> : vector<6x128xf32>
    %49 = tpu.matmul %48, %3, %cst_24 {dimension_numbers = #tpu.dot_dimension_numbers<[1], [0], [0], [1], [0, 0, 1, 1], [], []>} : vector<6x128xbf16>, vector<128x128xbf16>, vector<6x128xf32> -> vector<6x128xf32>
    %50 = vector.broadcast %4 : vector<1x128xf32> to vector<6x128xf32>
    %51 = arith.addf %49, %50 : vector<6x128xf32>
    %52 = vector.extract_strided_slice %51 {offsets = [0, 0], sizes = [2, 128], strides = [1, 1]} : vector<6x128xf32> to vector<2x128xf32>
    %53 = vector.extract_strided_slice %51 {offsets = [2, 0], sizes = [2, 128], strides = [1, 1]} : vector<6x128xf32> to vector<2x128xf32>
    %54 = vector.extract_strided_slice %51 {offsets = [4, 0], sizes = [2, 128], strides = [1, 1]} : vector<6x128xf32> to vector<2x128xf32>
    %55 = arith.mulf %52, %52 : vector<2x128xf32>
    %56 = arith.mulf %53, %53 : vector<2x128xf32>
    %57 = arith.mulf %54, %54 : vector<2x128xf32>
    %58 = arith.mulf %52, %53 : vector<2x128xf32>
    %59 = arith.mulf %52, %54 : vector<2x128xf32>
    %60 = tpu.concatenate %55, %56, %57, %58, %59 in 0 : vector<2x128xf32>, vector<2x128xf32>, vector<2x128xf32>, vector<2x128xf32>, vector<2x128xf32> -> vector<10x128xf32>
    %cst_25 = arith.constant dense<0.000000e+00> : vector<10xf32>
    %61 = vector.multi_reduction <add>, %60, %cst_25 [1] : vector<10x128xf32> to vector<10xf32>
    %62 = vector.shape_cast %61 : vector<10xf32> to vector<10x1xf32>
    %63 = vector.extract_strided_slice %62 {offsets = [0, 0], sizes = [2, 1], strides = [1, 1]} : vector<10x1xf32> to vector<2x1xf32>
    %64 = vector.extract_strided_slice %62 {offsets = [2, 0], sizes = [2, 1], strides = [1, 1]} : vector<10x1xf32> to vector<2x1xf32>
    %65 = vector.extract_strided_slice %62 {offsets = [4, 0], sizes = [2, 1], strides = [1, 1]} : vector<10x1xf32> to vector<2x1xf32>
    %66 = vector.extract_strided_slice %62 {offsets = [6, 0], sizes = [2, 1], strides = [1, 1]} : vector<10x1xf32> to vector<2x1xf32>
    %67 = vector.extract_strided_slice %62 {offsets = [8, 0], sizes = [2, 1], strides = [1, 1]} : vector<10x1xf32> to vector<2x1xf32>
    %68 = math.sqrt %63 : vector<2x1xf32>
    %cst_26 = arith.constant 9.99999993E-9 : f32
    %69 = vector.broadcast %cst_26 : f32 to vector<2x1xf32>
    %70 = arith.maximumf %68, %69 : vector<2x1xf32>
    %71 = math.sqrt %64 : vector<2x1xf32>
    %cst_27 = arith.constant 9.99999993E-9 : f32
    %72 = vector.broadcast %cst_27 : f32 to vector<2x1xf32>
    %73 = arith.maximumf %71, %72 : vector<2x1xf32>
    %74 = math.sqrt %65 : vector<2x1xf32>
    %cst_28 = arith.constant 9.99999993E-9 : f32
    %75 = vector.broadcast %cst_28 : f32 to vector<2x1xf32>
    %76 = arith.maximumf %74, %75 : vector<2x1xf32>
    %77 = arith.mulf %70, %73 : vector<2x1xf32>
    %78 = arith.divf %66, %77 : vector<2x1xf32>
    %79 = arith.mulf %70, %76 : vector<2x1xf32>
    %80 = arith.divf %67, %79 : vector<2x1xf32>
    %cst_29 = arith.constant 1.000000e+00 : f32
    %81 = vector.broadcast %cst_29 : f32 to vector<2x1xf32>
    %82 = arith.subf %81, %78 : vector<2x1xf32>
    %83 = arith.addf %82, %80 : vector<2x1xf32>
    %cst_30 = arith.constant 0.000000e+00 : f32
    %84 = vector.broadcast %cst_30 : f32 to vector<2x1xf32>
    %85 = arith.maximumf %83, %84 : vector<2x1xf32>
    %cst_31 = arith.constant dense<0.000000e+00> : vector<1xf32>
    %86 = vector.multi_reduction <add>, %85, %cst_31 [0] : vector<2x1xf32> to vector<1xf32>
    %87 = vector.shape_cast %86 : vector<1xf32> to vector<1x1xf32>
    %cst_32 = arith.constant 5.000000e-01 : f32
    %88 = vector.broadcast %cst_32 : f32 to vector<1x1xf32>
    %89 = arith.mulf %87, %88 : vector<1x1xf32>
    %c0_33 = arith.constant 0 : index
    %c0_34 = arith.constant 0 : index
    %90 = vector.load %arg7[%c0_33, %c0_34] : memref<1x1xf32, #tpu.memory_space<vmem>>, vector<1x1xf32>
    tpu.vector_store %arg7[%c0_33, %c0_34], %89 {strides = array<i32>} : memref<1x1xf32, #tpu.memory_space<vmem>>, vector<1x1xf32>,
    return
  }
}

</mosaic_0001>

<bundles_post_ra>
// kernel: tpu_custom_call.1
= control target key start
LH: loop header
LB: loop body
LE: loop exit
PB: predicated region body
PF: predicated region fallthrough
CT: control target
= control target key end

     0   :  { %13 = vsyncpa [#allocation4], 0  ;;  %s844_s0 = inlined_call_operand.hbm [shape: f32[2,8,128], index: 0, kind: input, shape index: {}]   ;;  %s845_s1 = inlined_call_operand.hbm [shape: f32[2,8,128], index: 1, kind: input, shape index: {}]   ;;  %s846_s2 = inlined_call_operand.hbm [shape: f32[2,8,128], index: 2, kind: input, shape index: {}]   ;;  %s847_s3 = inlined_call_operand.vmem [shape: f32[1,128], index: 3, kind: input, shape index: {}]   ;;  %s848_s4 = inlined_call_operand.<no memory space> [shape: f32[1], index: 4, kind: input, shape index: {}]   ;;  %s849_s5 = inlined_call_operand.hbm [shape: bf16[128,128], index: 5, kind: input, shape index: {}]   ;;  %s850_s6 = inlined_call_operand.vmem [shape: f32[1,128], index: 6, kind: input, shape index: {}]   ;;  %s851_s7 = inlined_call_operand.hbm [shape: f32[1,1], index: 7, kind: output, shape index: {}]  }
   0x1   :  { %14 = vsyncpa [#allocation7], 0 }
   0x2   :  { %15 = vsyncpa [#allocation10], 0 }
   0x3   :  { %16 = vsyncpa [#allocation5], 0  ;;  %s34_s26 = sshll.u32 %s845_s1, 4  ;;  %s704_s27 = smov [#allocation6]   ;;  %s35_s26 = int_to_ptr.hbm [resolvable:$true] %s34_s26 }
   0x4   :  { %s36_s28 = sshll.u32 %s704_s27, 4  ;;  %s21_s8 = sshll.u32 %s844_s0, 4  ;;  %s37_s28 = int_to_ptr.vmem [resolvable:$true] %s36_s28  ;;  %s22_s8 = int_to_ptr.hbm [resolvable:$true] %s21_s8 }
   0x5   :  { %s705_s9 = smov 128   ;;  %s706_s10 = smov 8  }
   0x6   :  { %42 = dma.hbm_to_vmem [thread:$0]  %s35_s26, 256, %s37_s28, [#allocation7], %s705_s9, %s705_s9, %s706_s10  }
   0x7   :  { %s707_s11 = smov [#allocation3]   ;;  %s47_s15 = sshll.u32 %s846_s2, 4  ;;  %s48_s15 = int_to_ptr.hbm [resolvable:$true] %s47_s15 }
   0x8   :  { %s23_s12 = sshll.u32 %s707_s11, 4  ;;  %s64_s17 = sshll.u32 %s849_s5, 4  ;;  %s24_s12 = int_to_ptr.vmem [resolvable:$true] %s23_s12  ;;  %s65_s17 = int_to_ptr.hbm [resolvable:$true] %s64_s17 }
   0x9   :  { %29 = dma.hbm_to_vmem [thread:$0]  %s22_s8, 256, %s24_s12, [#allocation4], %s705_s9, %s705_s9, %s706_s10  }
   0xa   :  { %s708_s18 = smov [#allocation8]   ;;  %s709_s0 = smov [#allocation9]  }
   0xb   :  { %s49_s19 = sshll.u32 %s708_s18, 4  ;;  %s66_s20 = sshll.u32 %s709_s0, 4  ;;  %s50_s19 = int_to_ptr.vmem [resolvable:$true] %s49_s19  ;;  %s67_s20 = int_to_ptr.vmem [resolvable:$true] %s66_s20 }
   0xc   :  { %55 = dma.hbm_to_vmem [thread:$0]  %s48_s15, 256, %s50_s19, [#allocation7], %s705_s9, %s705_s9, %s706_s10  }
   0xd   :  { %s710_s21 = smov 64   ;;  %s711_s22 = smov 4  }
   0xe   :  { %72 = dma.hbm_to_vmem [thread:$0]  %s65_s17, 1024, %s67_s20, [#allocation10], %s710_s21, %s710_s21, %s711_s22  }
   0xf   :  { %696 = dma.done.wait [#allocation4], 256  }
  0x10   :  { %697 = vsyncadd [#allocation4], 4294967040 }
  0x11   :  { %698 = dma.done.wait [#allocation7], 512  }
  0x12   :  { %699 = vsyncadd [#allocation7], 4294966784 }
  0x13   :  { %700 = dma.done.wait [#allocation10], 1024  }
  0x14   :  { %701 = vsyncadd [#allocation10], 4294966272  ;;  %v550_v0 = vld [vmem:[%s847_s3] ss:$0 sm:$0xff]  ;;  %v769_v1 = vld [vmem:[#allocation6] sm:$0xff]  ;;  %v121_v9 = vstv %s848_s4  ;;  %s488_s28 = sshll.u32 %s851_s7, 4  ;;  %s489_s28 = int_to_ptr.hbm [resolvable:$true] %s488_s28 }
  0x15   :  { %v771_v2 = vld [vmem:[#allocation3] sm:$0xff]  ;;  %v200_v3 = vmul.f32 %v550_v0, %v769_v1  ;;  %v775_v5 = vld [vmem:[#allocation6 + $0x8] sm:$0xff]  ;;  %v777_v6 = vld [vmem:[#allocation3 + $0x8] sm:$0xff] }
  0x16   :  { %v115_v4 = vmul.f32 %v550_v0, %v771_v2  ;;  %v201_v7 = vmul.f32 %v550_v0, %v775_v5  ;;  %v116_v8 = vmul.f32 %v550_v0, %v777_v6  ;;  %v539_v38 = vld [vmem:[#allocation9 + $0x38] sm:$0xff]  ;;  %v538_v43 = vld [vmem:[#allocation9 + $0x30] sm:$0xff]  ;;  %v537_v48 = vld [vmem:[#allocation9 + $0x28] sm:$0xff] }
  0x17   :  { %202 = vadd.xlane.f32.xlu1 %v200_v3  ;;  %376 = vmatpush.bf16.msra.mxu0 %v539_v38  ;;  %v536_v54 = vld [vmem:[#allocation9 + $0x20] sm:$0xff]  ;;  %v535_v60 = vld [vmem:[#allocation9 + $0x18] sm:$0xff] }
  0x18   :  { %117 = vadd.xlane.f32.xlu0 %v115_v4  ;;  %v534_v4 = vld [vmem:[#allocation9 + $0x10] sm:$0xff] }
  0x1b   :  { %377 = vmatpush.bf16.msra.mxu0 %v538_v43 }
  0x1f   :  { %204 = vadd.xlane.f32.xlu1 %v201_v7  ;;  %378 = vmatpush.bf16.msra.mxu0 %v537_v48 }
  0x20   :  { %119 = vadd.xlane.f32.xlu0 %v116_v8 }
  0x23   :  { %379 = vmatpush.bf16.msra.mxu0 %v536_v54 }
  0x27   :  { %380 = vmatpush.bf16.msra.mxu0 %v535_v60 }
  0x2b   :  { %381 = vmatpush.bf16.msra.mxu0 %v534_v4 }
  0x8a   :  { %v203_v10 = vpop.xlane.xlu1 %202 }
  0x8b   :  { %v118_v11 = vpop.xlane.xlu0 %117  ;;  %v206_v12 = vadd.f32 %v203_v10, %v121_v9 }
  0x8c   :  { %v122_v13 = vadd.f32 %v121_v9, %v118_v11 }
  0x8d   :  { %v208_v14 = vrot.slane %v206_v12, 4 }
  0x8e   :  { %v124_v15 = vrot.slane %v122_v13, 4 }
  0x8f   :  { %v209_v16 = vmax.f32 %v206_v12, %v208_v14 }
  0x90   :  { %v125_v17 = vmax.f32 %v122_v13, %v124_v15 }
  0x91   :  { %v210_v18 = vrot.slane %v209_v16, 2 }
  0x92   :  { %v126_v19 = vrot.slane %v125_v17, 2  ;;  %v205_v20 = vpop.xlane.xlu1 %204 }
  0x93   :  { %v120_v21 = vpop.xlane.xlu0 %119  ;;  %v211_v22 = vmax.f32 %v209_v16, %v210_v18  ;;  %v207_v24 = vadd.f32 %v205_v20, %v121_v9  ;;  %v533_v16 = vld [vmem:[#allocation9 + $0x8] sm:$0xff]  ;;  %v282_v18 = vld [vmem:[#allocation8] sm:$0xff]  ;;  %v283_v20 = vld [vmem:[#allocation8 + $0x8] sm:$0xff] }
  0x94   :  { %v127_v23 = vmax.f32 %v125_v17, %v126_v19  ;;  %v123_v25 = vadd.f32 %v121_v9, %v120_v21  ;;  %382 = vmatpush.bf16.msra.mxu0 %v533_v16 }
  0x95   :  { %v212_v26 = vrot.slane %v211_v22, 1  ;;  %v214_v28 = vrot.slane %v207_v24, 4 }
  0x96   :  { %v128_v27 = vrot.slane %v127_v23, 1  ;;  %v130_v29 = vrot.slane %v123_v25, 4 }
  0x97   :  { %v213_v30 = vmax.f32 %v211_v22, %v212_v26  ;;  %v215_v32 = vmax.f32 %v207_v24, %v214_v28  ;;  %v290_v26 = vrot.slane %v283_v20, 4 }
  0x98   :  { %v129_v31 = vmax.f32 %v127_v23, %v128_v27  ;;  %v131_v33 = vmax.f32 %v123_v25, %v130_v29  ;;  %v532_v23 = vld [vmem:[#allocation9] sm:$0xff] }
  0x99   :  { %v220_v34 = vsub.f32 %v206_v12, %v213_v30  ;;  %v216_v36 = vrot.slane %v215_v32, 2  ;;  %v712_v30 = vmov 8.0   ;;  %383 = vmatpush.bf16.msra.mxu0 %v532_v23 }
  0x9a   :  { %v136_v35 = vsub.f32 %v122_v13, %v129_v31  ;;  %v132_v37 = vrot.slane %v131_v33, 2 }
  0x9b   :  { %v222_v39 = vmul.f32 1.442695, %v220_v34  ;;  %v217_v41 = vmax.f32 %v215_v32, %v216_v36  ;;  %v291_v36 = vadd.f32 %v290_v26, %v283_v20 }
  0x9c   :  { %v138_v40 = vmul.f32 1.442695, %v136_v35  ;;  %v133_v42 = vmax.f32 %v131_v33, %v132_v37 }
  0x9d   :  { %552 = vpow2.f32 %v222_v39  ;;  %v218_v44 = vrot.slane %v217_v41, 1 }
  0x9e   :  { %v134_v45 = vrot.slane %v133_v42, 1  ;;  %554 = vpow2.f32 %v138_v40 }
  0x9f   :  { %v219_v46 = vmax.f32 %v217_v41, %v218_v44 }
  0xa0   :  { %v135_v47 = vmax.f32 %v133_v42, %v134_v45 }
  0xa1   :  { %v221_v49 = vsub.f32 %v207_v24, %v219_v46  ;;  %v284_v24 = vrot.slane %v282_v18, 4 }
  0xa2   :  { %v137_v50 = vsub.f32 %v123_v25, %v135_v47  ;;  %v292_v47 = vrot.slane %v291_v36, 2 }
  0xa3   :  { %v784_v51 = vpop.eup %552  ;;  %v224_v52 = vmul.f32 1.442695, %v221_v49  ;;  %v285_v34 = vadd.f32 %v284_v24, %v282_v18 }
  0xa4   :  { %v140_v53 = vmul.f32 1.442695, %v137_v50  ;;  %v786_v55 = vpop.eup %554  ;;  %v226_v56 = vrot.slane %v784_v51, 4 }
  0xa5   :  { %v142_v57 = vrot.slane %v786_v55, 4  ;;  %556 = vpow2.f32 %v224_v52  ;;  %v286_v43 = vrot.slane %v285_v34, 2 }
  0xa6   :  { %v227_v58 = vadd.f32 %v784_v51, %v226_v56  ;;  %558 = vpow2.f32 %v140_v53 }
  0xa7   :  { %v143_v59 = vadd.f32 %v786_v55, %v142_v57 }
  0xa8   :  { %v228_v61 = vrot.slane %v227_v58, 2 }
  0xa9   :  { %v144_v62 = vrot.slane %v143_v59, 2 }
  0xaa   :  { %v229_v63 = vadd.f32 %v228_v61, %v227_v58  ;;  %v287_v58 = vadd.f32 %v286_v43, %v285_v34 }
  0xab   :  { %v792_v0 = vpop.eup %556  ;;  %v145_v3 = vadd.f32 %v144_v62, %v143_v59 }
  0xac   :  { %v794_v7 = vpop.eup %558  ;;  %v230_v8 = vrot.slane %v229_v63, 1  ;;  %v232_v9 = vrot.slane %v792_v0, 4 }
  0xad   :  { %v146_v10 = vrot.slane %v145_v3, 1  ;;  %v148_v11 = vrot.slane %v794_v7, 4 }
  0xae   :  { %v231_v12 = vadd.f32 %v230_v8, %v229_v63  ;;  %v233_v13 = vadd.f32 %v792_v0, %v232_v9  ;;  %v293_v63 = vadd.f32 %v292_v47, %v291_v36  ;;  %v288_v36 = vrot.slane %v287_v58, 1 }
  0xaf   :  { %v147_v14 = vadd.f32 %v146_v10, %v145_v3  ;;  %v149_v15 = vadd.f32 %v794_v7, %v148_v11 }
  0xb0   :  { %560 = vrcp.f32 %v231_v12  ;;  %v234_v17 = vrot.slane %v233_v13, 2  ;;  %v247_v37 = vand.u32 2147483647, %v231_v12  ;;  %v249_v42 = vand.u32 2147483648, %v231_v12 }
  0xb1   :  { %562 = vrcp.f32 %v147_v14  ;;  %v150_v19 = vrot.slane %v149_v15, 2  ;;  %v163_v39 = vand.u32 2147483647, %v147_v14  ;;  %v165_v40 = vand.u32 2147483648, %v147_v14 }
  0xb2   :  { %v235_v21 = vadd.f32 %v234_v17, %v233_v13  ;;  %564 = vrcp.f32 %v712_v30  ;;  %vm159_vm2 = vweird.f32 %v147_v14  ;;  %vm243_vm3 = vweird.f32 %v231_v12 }
  0xb3   :  { %v151_v22 = vadd.f32 %v150_v19, %v149_v15  ;;  %vm808_vm4 = vcmp.eq.f32.partialorder %v247_v37, 8.507059e+37  ;;  %vm164_vm5 = vcmp.eq.f32.partialorder %v163_v39, 8.507059e+37  ;;  %v166_v52 = vor.u32 1.1754944e-38, %v165_v40 }
  0xb4   :  { %v236_v25 = vrot.slane %v235_v21, 1  ;;  %v250_v56 = vor.u32 1.1754944e-38, %v249_v42  ;;  %v294_v37 = vrot.slane %v293_v63, 1 }
  0xb5   :  { %v152_v27 = vrot.slane %v151_v22, 1 }
  0xb6   :  { %v561_v28 = vpop.eup %560  ;;  %v800_v29 = vadd.f32 %v236_v25, %v235_v21 }
  0xb7   :  { %v563_v31 = vpop.eup %562  ;;  %v802_v32 = vadd.f32 %v152_v27, %v151_v22  ;;  %v239_v33 = vmul.f32 %v561_v28, %v231_v12  ;;  %vm244_vm0 = vweird.f32 %v561_v28 }
  0xb8   :  { %566 = vrcp.f32 %v800_v29  ;;  %v155_v35 = vmul.f32 %v563_v31, %v147_v14  ;;  %v806_v44 = vpop.eup %564  ;;  %vm160_vm1 = vweird.f32 %v563_v31  ;;  %vm245_vm6 = vmor %vm243_vm3, %vm244_vm0  ;;  %v264_v13 = vand.u32 2147483648, %v800_v29 }
  0xb9   :  { %568 = vrcp.f32 %v802_v32  ;;  %v240_v41 = vsub.f32 1.0, %v239_v33  ;;  %vm161_vm7 = vmor %vm159_vm2, %vm160_vm1  ;;  %v297_v59 = vmul.f32 8.0, %v806_v44  ;;  %v178_v4 = vand.u32 2147483647, %v802_v32 }
  0xba   :  { %v156_v38 = vsub.f32 1.0, %v155_v35  ;;  %v180_v14 = vand.u32 2147483648, %v802_v32  ;;  %v262_v16 = vand.u32 2147483647, %v800_v29  ;;  %vm174_vm10 = vweird.f32 %v802_v32 }
  0xbb   :  { %v241_v46 = vmul.f32 %v561_v28, %v240_v41  ;;  %vm258_vm11 = vweird.f32 %v800_v29  ;;  %v265_v22 = vor.u32 1.1754944e-38, %v264_v13  ;;  %vm179_vm14 = vcmp.eq.f32.partialorder %v178_v4, 8.507059e+37 }
  0xbc   :  { %v157_v45 = vmul.f32 %v563_v31, %v156_v38  ;;  %v181_v24 = vor.u32 1.1754944e-38, %v180_v14  ;;  %vm263_vm15 = vcmp.eq.f32.partialorder %v262_v16, 8.507059e+37  ;;  %vm301_vm0 = vweird.f32 %v806_v44 }
  0xbd   :  { %v242_v53 = vadd.f32 %v561_v28, %v241_v46  ;;  %vm307_vm1 = vcmask 1041409   ;;  %vm317_vm2 = vcmask 1045509   ;;  %vm312_vm3 = vcmask 1043459  }
  0xbe   :  { %v567_v49 = vpop.eup %566  ;;  %v158_v50 = vadd.f32 %v563_v31, %v157_v45  ;;  %v289_v45 = vadd.f32 %v288_v36, %v287_v58 }
  0xbf   :  { %v569_v54 = vpop.eup %568  ;;  %v254_v57 = vmul.f32 %v567_v49, %v800_v29  ;;  %v246_v62 = vsel %vm245_vm6, %v561_v28, %v242_v53  ;;  %vm259_vm8 = vweird.f32 %v567_v49  ;;  %vm401_vm6 = vcmask 1045504  }
  0xc0   :  { %v162_v60 = vsel %vm161_vm7, %v563_v31, %v158_v50  ;;  %v170_v61 = vmul.f32 %v569_v54, %v802_v32  ;;  %v251_v8 = vsel %vm808_vm4, %v250_v56, %v246_v62  ;;  %vm175_vm9 = vweird.f32 %v569_v54  ;;  %vm260_vm12 = vmor %vm258_vm11, %vm259_vm8 }
  0xc1   :  { %v167_v3 = vsel %vm164_vm5, %v166_v52, %v162_v60  ;;  %v255_v9 = vsub.f32 1.0, %v254_v57  ;;  %v252_v12 = vmul.f32 %v784_v51, %v251_v8  ;;  %v298_v51 = vsub.f32 1.0, %v297_v59  ;;  %vm176_vm13 = vmor %vm174_vm10, %vm175_vm9  ;;  %v551_v8 = vld [vmem:[%s850_s6] ss:$0 sm:$0xff]  ;;  %s713_s6 = smov [#allocation11]  }
  0xc2   :  { %v168_v10 = vmul.f32 %v786_v55, %v167_v3  ;;  %v171_v11 = vsub.f32 1.0, %v170_v61  ;;  %vm320_vm4 = vcmask 1041408   ;;  %vm322_vm5 = vcmask 1043456   ;;  %s486_s25 = sshll.u32 %s713_s6, 4  ;;  %s487_s25 = int_to_ptr.vmem [resolvable:$true] %s486_s25 }
  0xc3   :  { %v256_v15 = vmul.f32 %v567_v49, %v255_v9  ;;  %v268_v19 = vmul.f32 %v252_v12, %v769_v1  ;;  %v299_v29 = vmul.f32 %v806_v44, %v298_v51 }
  0xc4   :  { %v172_v17 = vmul.f32 %v569_v54, %v171_v11  ;;  %v184_v18 = vmul.f32 %v168_v10, %v771_v2 }
  0xc5   :  { %v257_v55 = vadd.f32 %v567_v49, %v256_v15  ;;  %v270_v23 = vrot.slane %v268_v19, 4  ;;  %v300_v39 = vadd.f32 %v806_v44, %v299_v29 }
  0xc6   :  { %v173_v20 = vadd.f32 %v569_v54, %v172_v17  ;;  %v186_v21 = vrot.slane %v184_v18, 4 }
  0xc7   :  { %v261_v25 = vsel %vm260_vm12, %v567_v49, %v257_v55  ;;  %v271_v1 = vadd.f32 %v270_v23, %v268_v19 }
  0xc8   :  { %v177_v26 = vsel %vm176_vm13, %v569_v54, %v173_v20  ;;  %v187_v2 = vadd.f32 %v186_v21, %v184_v18  ;;  %v266_v27 = vsel %vm263_vm15, %v265_v22, %v261_v25 }
  0xc9   :  { %v182_v28 = vsel %vm179_vm14, %v181_v24, %v177_v26  ;;  %v267_v30 = vmul.f32 %v792_v0, %v266_v27  ;;  %v272_v33 = vrot.slane %v271_v1, 2 }
  0xca   :  { %v183_v31 = vmul.f32 %v794_v7, %v182_v28  ;;  %v188_v35 = vrot.slane %v187_v2, 2  ;;  %v295_v7 = vadd.f32 %v294_v37, %v293_v63 }
  0xcb   :  { %v269_v32 = vmul.f32 %v267_v30, %v775_v5  ;;  %v273_v41 = vadd.f32 %v272_v33, %v271_v1  ;;  %v302_v5 = vsel %vm301_vm0, %v806_v44, %v300_v39 }
  0xcc   :  { %v185_v34 = vmul.f32 %v183_v31, %v777_v6  ;;  %v189_v42 = vadd.f32 %v188_v35, %v187_v2  ;;  %v303_v52 = vmul.f32 %v302_v5, %v289_v45  ;;  %v304_v53 = vmul.f32 %v302_v5, %v295_v7 }
  0xcd   :  { %v276_v38 = vrot.slane %v269_v32, 4  ;;  %v274_v6 = vrot.slane %v273_v41, 1 }
  0xce   :  { %v192_v40 = vrot.slane %v185_v34, 4  ;;  %v190_v49 = vrot.slane %v189_v42, 1  ;;  %v308_v61 = vsel %vm307_vm1, %v304_v53, %v303_v52  ;;  %vm470_vm1 = vcmask 1024  }
  0xcf   :  { %v277_v0 = vadd.f32 %v276_v38, %v269_v32  ;;  %v275_v57 = vadd.f32 %v274_v6, %v273_v41 }
  0xd0   :  { %v193_v43 = vadd.f32 %v192_v40, %v185_v34  ;;  %v191_v60 = vadd.f32 %v190_v49, %v189_v42 }
  0xd1   :  { %v278_v46 = vrot.slane %v277_v0, 2 }
  0xd2   :  { %v194_v47 = vrot.slane %v193_v43, 2 }
  0xd3   :  { %v279_v48 = vadd.f32 %v278_v46, %v277_v0 }
  0xd4   :  { %v195_v50 = vadd.f32 %v194_v47, %v193_v43 }
  0xd5   :  { %v280_v54 = vrot.slane %v279_v48, 1 }
  0xd6   :  { %v196_v56 = vrot.slane %v195_v50, 1 }
  0xd7   :  { %v281_v59 = vadd.f32 %v280_v54, %v279_v48 }
  0xd8   :  { %v197_v58 = vadd.f32 %v196_v56, %v195_v50 }
  0xd9   :  { %v318_v62 = vsel %vm317_vm2, %v281_v59, %v275_v57  ;;  %vm479_vm2 = vcmask 0  }
  0xda   :  { %v313_v44 = vsel %vm312_vm3, %v197_v58, %v191_v60 }
  0xdb   :  { %v321_v63 = vsel %vm320_vm4, %v308_v61, %v313_v44 }
  0xdc   :  { %v323_v3 = vsel %vm322_vm5, %v321_v63, %v318_v62 }
  0xdd   :  { %v324_v4 = vpack.c.bf16 %v323_v3, %v323_v3 }
  0xdf   :  { %384 = vmatmul.bf16.vlgmr.msra.gmra.mxu0 %v324_v4 }
 0x15c   :  { %v385_v9 = vpop.f32.mrf.mxu0 }
 0x15d   :  { %v386_v10 = vadd.f32 %v551_v8, %v385_v9 }
 0x15f   :  { %v391_v11 = vrot.slane %v386_v10, 2  ;;  %v389_v13 = vmul.f32 %v386_v10, %v386_v10  ;;  %v394_v17 = vrot.slane %v386_v10, 4 }
 0x161   :  { %v393_v12 = vmul.f32 %v391_v11, %v386_v10  ;;  %v396_v18 = vmul.f32 %v394_v17, %v386_v10 }
 0x163   :  { %v398_v14 = vrot.slane %v393_v12, 2  ;;  %v405_v19 = vsel %vm320_vm4, %v396_v18, 0.0 }
 0x164   :  { %v387_v15 = vpop.f32.mrf.mxu0 }
 0x165   :  { %v402_v16 = vsel %vm401_vm6, %v389_v13, %v398_v14 }
 0x166   :  { %403 = vadd.xlane.f32.xlu2 %v402_v16 }
 0x16e   :  { %406 = vadd.xlane.f32.xlu2 %v405_v19 }
 0x1d9   :  { %v404_v55 = vpop.xlane.xlu2 %403 }
 0x1da   :  { %570 = vrsqrt.f32 %v404_v55  ;;  %vm415_vm7 = vcmp.eq.f32.partialorder %v404_v55, inf  ;;  %v418_v26 = vand.u32 2147483648, %v404_v55  ;;  %vm417_vm8 = vcmp.eq.f32.partialorder %v404_v55, 0.0 }
 0x1e0   :  { %v571_v51 = vpop.eup %570 }
 0x1e1   :  { %v409_v20 = vmul.f32 %v571_v51, %v404_v55  ;;  %v407_v48 = vpop.xlane.xlu2 %406 }
 0x1e3   :  { %v410_v21 = vmul.f32 %v571_v51, %v409_v20 }
 0x1e5   :  { %v411_v22 = vmul.f32 0.5, %v410_v21 }
 0x1e7   :  { %v412_v23 = vsub.f32 1.5, %v411_v22 }
 0x1e9   :  { %v413_v24 = vmul.f32 %v571_v51, %v412_v23 }
 0x1eb   :  { %v414_v25 = vmul.f32 %v413_v24, %v404_v55 }
 0x1ed   :  { %v416_v2 = vsel %vm415_vm7, %v404_v55, %v414_v25 }
 0x1ee   :  { %v419_v27 = vsel %vm417_vm8, %v418_v26, %v416_v2 }
 0x1ef   :  { %v420_v1 = vmax.f32 %v419_v27, 1e-08 }
 0x1f1   :  { %v422_v28 = vrot.slane %v420_v1, 2  ;;  %v443_v30 = vrot.slane %v420_v1, 4 }
 0x1f3   :  { %v424_v29 = vmul.f32 %v422_v28, %v420_v1  ;;  %v445_v31 = vmul.f32 %v443_v30, %v420_v1 }
 0x1f5   :  { %v426_v32 = vrot.slane %v424_v29, 2  ;;  %572 = vrcp.f32 %v445_v31  ;;  %v457_v38 = vand.u32 2147483648, %v445_v31  ;;  %v455_v41 = vand.u32 2147483647, %v445_v31 }
 0x1f6   :  { %vm451_vm10 = vweird.f32 %v445_v31 }
 0x1f7   :  { %574 = vrcp.f32 %v426_v32  ;;  %v439_v0 = vand.u32 2147483648, %v426_v32  ;;  %v437_v43 = vand.u32 2147483647, %v426_v32  ;;  %v458_v7 = vor.u32 1.1754944e-38, %v457_v38 }
 0x1f8   :  { %vm433_vm13 = vweird.f32 %v426_v32  ;;  %vm456_vm14 = vcmp.eq.f32.partialorder %v455_v41, 8.507059e+37 }
 0x1f9   :  { %v440_v47 = vor.u32 1.1754944e-38, %v439_v0  ;;  %vm438_vm0 = vcmp.eq.f32.partialorder %v437_v43, 8.507059e+37 }
 0x1fb   :  { %v573_v33 = vpop.eup %572 }
 0x1fc   :  { %v447_v34 = vmul.f32 %v573_v33, %v445_v31  ;;  %vm452_vm9 = vweird.f32 %v573_v33 }
 0x1fd   :  { %v575_v35 = vpop.eup %574  ;;  %vm453_vm12 = vmor %vm451_vm10, %vm452_vm9 }
 0x1fe   :  { %v429_v36 = vmul.f32 %v575_v35, %v426_v32  ;;  %v448_v37 = vsub.f32 1.0, %v447_v34  ;;  %vm434_vm11 = vweird.f32 %v575_v35 }
 0x1ff   :  { %vm435_vm15 = vmor %vm433_vm13, %vm434_vm11 }
 0x200   :  { %v430_v39 = vsub.f32 1.0, %v429_v36  ;;  %v449_v40 = vmul.f32 %v573_v33, %v448_v37 }
 0x202   :  { %v431_v42 = vmul.f32 %v575_v35, %v430_v39  ;;  %v450_v45 = vadd.f32 %v573_v33, %v449_v40 }
 0x204   :  { %v432_v46 = vadd.f32 %v575_v35, %v431_v42  ;;  %v454_v5 = vsel %vm453_vm12, %v573_v33, %v450_v45 }
 0x205   :  { %v459_v6 = vsel %vm456_vm14, %v458_v7, %v454_v5 }
 0x206   :  { %v436_v49 = vsel %vm435_vm15, %v575_v35, %v432_v46  ;;  %v460_v50 = vmul.f32 %v459_v6, %v407_v48 }
 0x207   :  { %v441_v52 = vsel %vm438_vm0, %v440_v47, %v436_v49 }
 0x208   :  { %v442_v53 = vmul.f32 %v441_v52, %v404_v55  ;;  %v463_v56 = vrot.slane %v460_v50, 2 }
 0x20a   :  { %v461_v54 = vsub.f32 1.0, %v442_v53 }
 0x20c   :  { %v465_v57 = vadd.f32 %v463_v56, %v461_v54 }
 0x20e   :  { %v466_v59 = vmax.f32 %v465_v57, 0.0 }
 0x210   :  { %v468_v60 = vrot.slane %v466_v59, 6 }
 0x212   :  { %v471_v58 = vsel %vm470_vm1, %v468_v60, 0.0 }
 0x213   :  { %v472_v61 = vrot.slane %v471_v58, 4 }
 0x215   :  { %v473_v62 = vadd.f32 %v472_v61, %v471_v58 }
 0x217   :  { %v474_v44 = vrot.slane %v473_v62, 2 }
 0x219   :  { %v475_v63 = vadd.f32 %v474_v44, %v473_v62 }
 0x21b   :  { %v476_v3 = vrot.slane %v475_v63, 1 }
 0x21d   :  { %v477_v4 = vadd.f32 %v476_v3, %v475_v63 }
 0x21f   :  { %v478_v8 = vmul.f32 0.5, %v477_v4 }
 0x221   :  { %480 = vst.msk [vmem:[#allocation11] sm:$0x1] %vm479_vm2, %v478_v8 }
 0x222   :  { %491 = dma.vmem_to_hbm [thread:$0]  %s487_s25, 16, %s489_s28, [#allocation5]  }
 0x223   :  { %702 = dma.done.wait [#allocation5], 16  }
 0x224   :  { %703 = vsyncadd [#allocation5], 4294967280 }
 0x225   :  { %496 = vsyncpa [#allocation4], 1 }
 0x226   :  { %497 = vsyncpa [#allocation7], 1 }
 0x227   :  { %498 = vsyncpa [#allocation10], 1 }
 0x228   :  { %499 = vsyncpa [#allocation5], 1 }

</bundles_post_ra>
